<compile_context>
chip_gen: v5e
topology: v5e:2x2
jax: 0.10.0
libtpu: 0.0.40
codegen_flags: <defaults>
</compile_context>

<pallas_src>
import jax
import jax.numpy as jnp
from jax.experimental import pallas as pl
from jax.experimental.pallas import tpu as pltpu

_LANE = 128


def _round_up(x, m):
    return (x + m - 1) // m * m


def _sublane_granule(dtype):
    # 8 for 4-byte dtypes, 16 for bf16/f16, 32 for int8/fp8 (sub-32-bit packs along sublanes).
    itemsize = jnp.dtype(dtype).itemsize
    return max(8, 32 // max(itemsize, 1))


def _fused_head_kernel(x_ref, w1_ref, b1_ref, w2_ref, b2_ref, o_ref, h_ref):
    """One M-tile of:  o = tanh(x @ W1 + b1) @ W2 + b2.

    x_ref:  (tm, d_in)        w1_ref: (d_in, h_pad)   b1_ref: (1, h_pad)
    w2_ref: (h_pad, l_pad)    b2_ref: (1, l_pad)      o_ref:  (tm, l_pad)
    h_ref:  (tm, h_pad) f32 VMEM scratch (lane-dense, never written to HBM)
    """
    h_ref[...] = jnp.tanh(
        jnp.dot(x_ref[...], w1_ref[...], preferred_element_type=jnp.float32)
        + b1_ref[...])
    o_ref[...] = (
        jnp.dot(h_ref[...], w2_ref[...], preferred_element_type=jnp.float32)
        + b2_ref[...]).astype(o_ref.dtype)


def prepare_classification_head_params(w_dense, b_dense, w_out, b_out):
    """One-time parameter prep (do this at load time, not per forward call):
    transpose nn.Linear weights to (in, out) and zero-pad every 'out' dim to the
    128-lane granule so all in-kernel stores are lane-dense (unmasked vst)."""
    hidden = w_dense.shape[1]
    num_labels = w_out.shape[0]
    h_pad = _round_up(hidden, _LANE)
    l_pad = _round_up(num_labels, _LANE)

    w1_t = jnp.zeros((hidden, h_pad), w_dense.dtype).at[:, :hidden].set(w_dense.T)
    b1 = jnp.zeros((1, h_pad), b_dense.dtype).at[0, :hidden].set(b_dense)
    w2_t = jnp.zeros((h_pad, l_pad), w_out.dtype).at[:hidden, :num_labels].set(w_out.T)
    b2 = jnp.zeros((1, l_pad), b_out.dtype).at[0, :num_labels].set(b_out)

    return dict(w1_t=w1_t, b1=b1, w2_t=w2_t, b2=b2,
                hidden=hidden, num_labels=num_labels)


def classification_head(x, params, *, tm_max=512, vmem_limit_bytes=32 * 1024 * 1024):
    """ClassificationHead.forward (inference).

    x: (..., hidden). Returns logits shaped per TimeDistributed (batch_first=False),
    i.e. (-1, x.shape[1], num_labels) for >=3-D inputs.
    """
    # TODO(synk): nn.Dropout is identity in eval mode; training-mode PRNG dropout not implemented.
    # TODO(synk): optional bf16 operand cast (f32 accumulation) would help on v6e/v7x when
    #             compute-bound; kept f32 here to match the reference exactly.
    w1_t, b1, w2_t, b2 = params["w1_t"], params["b1"], params["w2_t"], params["b2"]
    num_labels = params["num_labels"]
    d_in, h_pad = w1_t.shape
    l_pad = w2_t.shape[1]

    orig_shape = x.shape
    assert orig_shape[-1] == d_in
    x_flat = x.reshape(-1, d_in)
    M = x_flat.shape[0]

    granule = _sublane_granule(x.dtype)

    # M tile: as large as allowed, but split into >=2 "parallel" tiles when possible so
    # megacore (v7x: 2 TCs) can shard the M axis.
    tm = min(tm_max, _round_up(M, granule))
    if M > granule and pl.cdiv(M, tm) < 2:
        tm = _round_up(pl.cdiv(M, 2), granule)

    # Shrink tm if the fully-resident-weights working set would not fit the VMEM budget
    # (double-buffered x/out tiles + resident W1/b1/W2/b2 + f32 h scratch).
    def _working_set_bytes(t):
        return 4 * (2 * t * d_in + 2 * d_in * h_pad + 2 * h_pad * l_pad
                    + 2 * h_pad + 2 * l_pad + t * h_pad + 2 * t * l_pad)
    while tm > granule and _working_set_bytes(tm) > vmem_limit_bytes:
        tm -= granule
    # TODO(synk): if weights alone ever exceed VMEM (huge hidden), fall back to K/N tiling.

    M_pad = _round_up(M, tm)
    if M_pad != M:
        x_flat = jnp.pad(x_flat, ((0, M_pad - M), (0, 0)))

    grid = (M_pad // tm,)

    y_pad = pl.pallas_call(
        _fused_head_kernel,
        out_shape=jax.ShapeDtypeStruct((M_pad, l_pad), x.dtype),
        grid_spec=pltpu.PrefetchScalarGridSpec(
            num_scalar_prefetch=0,
            grid=grid,
            in_specs=[
                pl.BlockSpec((tm, d_in), lambda i: (i, 0)),      # x row tile
                pl.BlockSpec((d_in, h_pad), lambda i: (0, 0)),   # W1^T, resident
                pl.BlockSpec((1, h_pad), lambda i: (0, 0)),      # b1,   resident
                pl.BlockSpec((h_pad, l_pad), lambda i: (0, 0)),  # W2^T, resident
                pl.BlockSpec((1, l_pad), lambda i: (0, 0)),      # b2,   resident
            ],
            out_specs=pl.BlockSpec((tm, l_pad), lambda i: (i, 0)),
            scratch_shapes=[pltpu.VMEM((tm, h_pad), jnp.float32)],
        ),
        compiler_params=pltpu.CompilerParams(
            dimension_semantics=("parallel",),
            vmem_limit_bytes=vmem_limit_bytes,
        ),
    )(x_flat, w1_t, b1, w2_t, b2)

    # Single slice at the very end: drop padded rows and padded label lanes.
    y = y_pad[:M, :num_labels]

    if len(orig_shape) <= 2:
        return y
    # TimeDistributed with batch_first=False: y.view(-1, x.size(1), num_labels)
    return y.reshape(-1, orig_shape[1], num_labels)


if __name__ == "__main__":
    # Small shapes consistent with the module: batch=2, seq=8, hidden=32, num_labels=4
    B, S, HIDDEN, NUM_LABELS = 2, 8, 32, 4

    key = jax.random.PRNGKey(0)
    kx, kw1, kb1, kw2, kb2 = jax.random.split(key, 5)

    x = jax.random.normal(kx, (B, S, HIDDEN), dtype=jnp.float32)

    # nn.Linear-style params: weight (OUT, IN), bias (OUT,)
    bound = 1.0 / (HIDDEN ** 0.5)
    w_dense = jax.random.uniform(kw1, (HIDDEN, HIDDEN), jnp.float32, -bound, bound)
    b_dense = jax.random.uniform(kb1, (HIDDEN,), jnp.float32, -bound, bound)
    w_out = jax.random.uniform(kw2, (NUM_LABELS, HIDDEN), jnp.float32, -bound, bound)
    b_out = jax.random.uniform(kb2, (NUM_LABELS,), jnp.float32, -bound, bound)

    # One-time parameter prep (transpose + lane-pad), done at load time.
    params = prepare_classification_head_params(w_dense, b_dense, w_out, b_out)

    y = classification_head(x, params)
    y = jax.block_until_ready(y)

    # Pure-JAX reference (dropout = identity in eval mode)
    h_ref = jnp.tanh(x.reshape(-1, HIDDEN) @ w_dense.T + b_dense)
    y_ref = (h_ref @ w_out.T + b_out).reshape(B, S, NUM_LABELS)

    assert y.shape == (B, S, NUM_LABELS)
    assert jnp.allclose(y, y_ref, atol=1e-5, rtol=1e-5), float(jnp.max(jnp.abs(y - y_ref)))

    print("KERNEL_OK")
</pallas_src>

<mosaic_0001>
module attributes {stable_mosaic.version = 11 : i64} {
  func.func @_fused_head_kernel(%arg0: i32, %arg1: memref<8x32xf32, #tpu.memory_space<vmem>>, %arg2: memref<32x128xf32, #tpu.memory_space<vmem>>, %arg3: memref<1x128xf32, #tpu.memory_space<vmem>>, %arg4: memref<128x128xf32, #tpu.memory_space<vmem>>, %arg5: memref<1x128xf32, #tpu.memory_space<vmem>>, %arg6: memref<8x128xf32, #tpu.memory_space<vmem>>, %arg7: memref<8x128xf32, #tpu.memory_space<vmem>>) attributes {dimension_semantics = [#tpu.dimension_semantics<parallel>], iteration_bounds = array<i64: 2>, scalar_prefetch = 0 : i64, scratch_operands = 1 : i64, tpu.core_type = #tpu.core_type<tc>, window_params = [{transform_indices = @transform_0, window_bounds = array<i64: 8, 32>}, {pipeline_mode = #tpu.pipeline_mode<synchronous>, transform_indices = @transform_1, window_bounds = array<i64: 32, 128>}, {pipeline_mode = #tpu.pipeline_mode<synchronous>, transform_indices = @transform_2, window_bounds = array<i64: 1, 128>}, {pipeline_mode = #tpu.pipeline_mode<synchronous>, transform_indices = @transform_3, window_bounds = array<i64: 128, 128>}, {pipeline_mode = #tpu.pipeline_mode<synchronous>, transform_indices = @transform_4, window_bounds = array<i64: 1, 128>}, {transform_indices = @transform_5, window_bounds = array<i64: 8, 128>}]} {
    %c0 = arith.constant 0 : index
    %c0_0 = arith.constant 0 : index
    %0 = vector.load %arg1[%c0, %c0_0] : memref<8x32xf32, #tpu.memory_space<vmem>>, vector<8x32xf32>
    %c0_1 = arith.constant 0 : index
    %c0_2 = arith.constant 0 : index
    %1 = vector.load %arg2[%c0_1, %c0_2] : memref<32x128xf32, #tpu.memory_space<vmem>>, vector<32x128xf32>
    %cst = arith.constant dense<0.000000e+00> : vector<8x128xf32>
    %2 = tpu.matmul %0, %1, %cst {dimension_numbers = #tpu.dot_dimension_numbers<[1], [0], [0], [1], [0, 0, 1, 1], [], []>} : vector<8x32xf32>, vector<32x128xf32>, vector<8x128xf32> -> vector<8x128xf32>
    %c0_3 = arith.constant 0 : index
    %c0_4 = arith.constant 0 : index
    %3 = vector.load %arg3[%c0_3, %c0_4] : memref<1x128xf32, #tpu.memory_space<vmem>>, vector<1x128xf32>
    %4 = vector.broadcast %3 : vector<1x128xf32> to vector<8x128xf32>
    %5 = arith.addf %2, %4 : vector<8x128xf32>
    %6 = math.tanh %5 : vector<8x128xf32>
    %c0_5 = arith.constant 0 : index
    %c0_6 = arith.constant 0 : index
    %7 = vector.load %arg7[%c0_5, %c0_6] : memref<8x128xf32, #tpu.memory_space<vmem>>, vector<8x128xf32>
    tpu.vector_store %arg7[%c0_5, %c0_6], %6 {strides = array<i32>} : memref<8x128xf32, #tpu.memory_space<vmem>>, vector<8x128xf32>,
    %c0_7 = arith.constant 0 : index
    %c0_8 = arith.constant 0 : index
    %8 = vector.load %arg7[%c0_7, %c0_8] : memref<8x128xf32, #tpu.memory_space<vmem>>, vector<8x128xf32>
    %c0_9 = arith.constant 0 : index
    %c0_10 = arith.constant 0 : index
    %9 = vector.load %arg4[%c0_9, %c0_10] : memref<128x128xf32, #tpu.memory_space<vmem>>, vector<128x128xf32>
    %cst_11 = arith.constant dense<0.000000e+00> : vector<8x128xf32>
    %10 = tpu.matmul %8, %9, %cst_11 {dimension_numbers = #tpu.dot_dimension_numbers<[1], [0], [0], [1], [0, 0, 1, 1], [], []>} : vector<8x128xf32>, vector<128x128xf32>, vector<8x128xf32> -> vector<8x128xf32>
    %c0_12 = arith.constant 0 : index
    %c0_13 = arith.constant 0 : index
    %11 = vector.load %arg5[%c0_12, %c0_13] : memref<1x128xf32, #tpu.memory_space<vmem>>, vector<1x128xf32>
    %12 = vector.broadcast %11 : vector<1x128xf32> to vector<8x128xf32>
    %13 = arith.addf %10, %12 : vector<8x128xf32>
    %c0_14 = arith.constant 0 : index
    %c0_15 = arith.constant 0 : index
    %14 = vector.load %arg6[%c0_14, %c0_15] : memref<8x128xf32, #tpu.memory_space<vmem>>, vector<8x128xf32>
    tpu.vector_store %arg6[%c0_14, %c0_15], %13 {strides = array<i32>} : memref<8x128xf32, #tpu.memory_space<vmem>>, vector<8x128xf32>,
    return
  }
  func.func @transform_0(%arg0: i32) -> (i32, i32) {
    %c0_i32 = arith.constant 0 : i32
    %c0_i32_0 = arith.constant 0 : i32
    return %arg0, %c0_i32 : i32, i32
  }
  func.func @transform_1(%arg0: i32) -> (i32, i32) {
    %c0_i32 = arith.constant 0 : i32
    %c0_i32_0 = arith.constant 0 : i32
    %c0_i32_1 = arith.constant 0 : i32
    return %c0_i32, %c0_i32_0 : i32, i32
  }
  func.func @transform_2(%arg0: i32) -> (i32, i32) {
    %c0_i32 = arith.constant 0 : i32
    %c0_i32_0 = arith.constant 0 : i32
    %c0_i32_1 = arith.constant 0 : i32
    return %c0_i32, %c0_i32_0 : i32, i32
  }
  func.func @transform_3(%arg0: i32) -> (i32, i32) {
    %c0_i32 = arith.constant 0 : i32
    %c0_i32_0 = arith.constant 0 : i32
    %c0_i32_1 = arith.constant 0 : i32
    return %c0_i32, %c0_i32_0 : i32, i32
  }
  func.func @transform_4(%arg0: i32) -> (i32, i32) {
    %c0_i32 = arith.constant 0 : i32
    %c0_i32_0 = arith.constant 0 : i32
    %c0_i32_1 = arith.constant 0 : i32
    return %c0_i32, %c0_i32_0 : i32, i32
  }
  func.func @transform_5(%arg0: i32) -> (i32, i32) {
    %c0_i32 = arith.constant 0 : i32
    %c0_i32_0 = arith.constant 0 : i32
    return %arg0, %c0_i32 : i32, i32
  }
}

</mosaic_0001>

<bundles_post_ra>
// kernel: tpu_custom_call.1
= control target key start
LH: loop header
LB: loop body
LE: loop exit
PB: predicated region body
PF: predicated region fallthrough
CT: control target
= control target key end

     0   :  { %10 = vsyncpa [#allocation4], 0  ;;  %s898_s0 = inlined_call_operand.hbm [shape: f32[16,32], index: 0, kind: input, shape index: {}]   ;;  %s899_s1 = inlined_call_operand.hbm [shape: f32[32,128], index: 1, kind: input, shape index: {}]   ;;  %s900_s2 = inlined_call_operand.vmem [shape: f32[1,128], index: 2, kind: input, shape index: {}]   ;;  %s901_s3 = inlined_call_operand.hbm [shape: f32[128,128], index: 3, kind: input, shape index: {}]   ;;  %s902_s4 = inlined_call_operand.vmem [shape: f32[1,128], index: 4, kind: input, shape index: {}]   ;;  %s903_s5 = inlined_call_operand.hbm [shape: f32[16,128], index: 5, kind: output, shape index: {}]  }
   0x1   :  { %12 = vsyncpa [#allocation4 + $0x1], 0 }
   0x2   :  { %13 = vsyncpa [#allocation7], 0 }
   0x3   :  { %14 = vsyncpa [#allocation5], 0 }
   0x4   :  { %16 = vsyncpa [#allocation5 + $0x1], 0  ;;  %s743_s18 = smov 0   ;;  %s745_s19 = smov 0  }
   0x5   :  { %s747_s20 = smov 0   ;;  %s749_s21 = smov 0  }
   0x6 LB: > { %s174_s24 = sshll.u32 %s899_s1, 4  ;;  %s767_s25 = sadd.s32 4294967295, %s707_s21   ;;  %s707_s21 = sphi %s749_s21, %s914_s21   ;;  %s703_s20 = sphi %s747_s20, %s913_s20   ;;  %s699_s19 = sphi %s745_s19, %s912_s19   ;;  %s695_s18 = sphi %s743_s18, %s911_s18   ;;  %s175_s24 = int_to_ptr.hbm [resolvable:$true] %s174_s24 }
   0x7   : > { %p458_p0 = scmp.ge.s32.totalorder %s707_s21, 1  ;;  %p43_p1 = scmp.eq.s32.totalorder %s767_s25, 0 }
   0x8   : > { %p163_p2 = scmp.lt.s32.totalorder %s707_s21, 3  ;;  %s709_s27 = smov [#allocation6]  }
   0x9   : > { %s176_s28 = sshll.u32 %s709_s27, 4  ;;  %s191_s6 = sshll.u32 %s901_s3, 4  ;;  %s177_s28 = int_to_ptr.vmem [resolvable:$true] %s176_s28  ;;  %s192_s6 = int_to_ptr.hbm [resolvable:$true] %s191_s6 }
   0xa   : > { %p772_p3 = pnand %p458_p0, %p163_p2  ;;  %s710_s7 = smov [#allocation8]  }
   0xb   : > { %s193_s8 = sshll.u32 %s710_s7, 4  ;;  %s711_s9 = smov 128   ;;  %s194_s8 = int_to_ptr.vmem [resolvable:$true] %s193_s8 }
   0xc   : > { %p486_p4 = pneg %p772_p3  ;;  %s712_s10 = smov 8  }
   0xd   : > { %s457_s11 = sadd.s32 4294967294, %s707_s21   ;;  %s786_s12 = sadd.s32 1, %s707_s21  }
   0xe   : > { %p487_p6 = pnand %p486_p4, %p43_p1  ;;  %s26_s13 = ssub.s32 %s707_s21, %s786_s12 }
   0xf   : > { %s29_s14 = sadd.s32 1, %s703_s20  ;;  %p27_p7 = scmp.eq.s32.totalorder %s26_s13, 0 }
  0x10   : > { %489 = dma.hbm_to_vmem [thread:$0]  (!%p487_p6), %s175_s24, 512, %s177_s28, [#allocation7], %s711_s9, %s711_s9, %s712_s10  }
  0x11   : > { %492 = dma.hbm_to_vmem [thread:$0]  (!%p487_p6), %s192_s6, 2048, %s194_s8, [#allocation7], %s711_s9, %s711_s9, %s712_s10  }
  0x12   : > { %p36_p8 = scmp.ne.s32.totalorder %s703_s20, %s699_s19  ;;  %p37_p9 = scmp.eq.s32.totalorder %s707_s21, 0 }
  0x13   : > { %p42_p10 = scmp.ne.s32.totalorder %s699_s19, %s695_s18  ;;  %p150_p13 = scmp.eq.s32.totalorder %s767_s25, 1 }
  0x14   : > { %s797_s15 = scalar_select %p27_p7, %s703_s20, %s29_s14  }
  0x15   : > { %p799_p11 = por %p37_p9, %p36_p8  ;;  %p805_p12 = por %p43_p1, %p42_p10 }
  0x16   : > { %p156_p0 = scmp.eq.s32.totalorder %s457_s11, 1  ;;  %p503_p2 = scmp.lt.s32.totalorder %s707_s21, 2 }
  0x17   : > { %s210_s22 = sand.u32 1, %s703_s20   ;;  %p812_p4 = por %p150_p13, %p36_p8 }
  0x18   : > { %p816_p6 = por %p156_p0, %p42_p10  ;;  %s462_s27 = sshll.u32 %s210_s22, 3 }
  0x19   : > { %s463_s28 = sshll.u32 %s707_s21, 3  ;;  %s214_s7 = scalar_lea.vmem [#allocation3], %s462_s27 }
  0x1a   : > { %s218_s6 = scalar_lea.hbm %s898_s0, %s463_s28  ;;  %s222_s8 = sshll.u32 %s214_s7, 4  ;;  %s223_s8 = int_to_ptr.vmem [resolvable:$true] %s222_s8 }
  0x1b   : > { %s220_s9 = sshll.u32 %s218_s6, 4  ;;  %p826_p7 = pnand %p503_p2, %p799_p11  ;;  %s221_s9 = int_to_ptr.hbm [resolvable:$true] %s220_s9 }
  0x1c   : > { %s211_s11 = scalar_lea.sflag [#allocation4], %s210_s22  ;;  %s607_s13 = sshra.s32 %s221_s9, 4  ;;  %s608_s13 = int_to_ptr.hbm [resolvable:$true] %s607_s13 }
  0x1d   : > { %s609_s14 = scalar_lea.hbm %s608_s13, 8  ;;  %p611_p9 = pneg %p826_p7 }
  0x1e   : > { %p610_p8 = scmp.ne.s32.totalorder %s608_s13, %s609_s14  ;;  %s614_s29 = scalar_lea.hbm %s898_s0, 16 }
  0x1f   : > { %p615_p11 = scmp.lt.s32.totalorder %s608_s13, %s898_s0  ;;  %p616_p0 = scmp.lt.s32.totalorder %s614_s29, %s609_s14 }
  0x20   : > { %p612_p10 = pnand %p611_p9, %p610_p8 }
  0x21   : > { %p617_p2 = por %p616_p0, %p615_p11 }
  0x22   : > { %p613_p13 = pneg %p612_p10 }
  0x24   : > { %p618_p5 = pnand %p617_p2, %p613_p13 }
  0x26   : > { %621 = shalt.err (!%p618_p5)
}
  0x27   : > { %496 = dma.hbm_to_vmem [thread:$0]  (!%p826_p7), %s221_s9, 128, %s223_s8, %s211_s11  }
  0x28   : > { %231 = sbr.rel (%p772_p3) target bundleno = 322 (0x142), region = 40  ;;  %s843_s22 = sand.u32 (!%p772_p3), 1, %s699_s19  }
  0x29   : > { %s465_s6 = sshll.u32 (!%p772_p3), %s843_s22, 3  ;;  %s234_s7 = scalar_lea.sflag (!%p772_p3), [#allocation4], %s843_s22 }
  0x2a   : > { %s237_s13 = scalar_lea.vmem (!%p772_p3), [#allocation3], %s465_s6 }
  0x2d   : > { %682 = dma.done.wait (%p805_p12), %s234_s7, 128  }
  0x2e   : > { %684 = vsyncadd (%p805_p12), %s234_s7, 4294967168 }
  0x2f   : > { %686 = dma.done.wait (%p43_p1), [#allocation7], 2560  }
  0x30   : > { %688 = vsyncadd (%p43_p1), [#allocation7], 4294964736  ;;  %v279_v0 = vld [vmem:[#allocation6 + $0x18] sm:$0xff]  ;;  %v278_v1 = vld [vmem:[#allocation6 + $0x10] sm:$0xff]  ;;  %vm284_vm0 = vcmask 261120   ;;  %s471_s8 = sshll.u32 %s767_s25, 3 }
  0x31   : > { %300 = vmatpush.msra.mxu0 %v279_v0  ;;  %v326_v2 = vld [vmem:[#allocation8 + $0x78] sm:$0xff]  ;;  %v277_v3 = vld [vmem:[#allocation6 + $0x8] sm:$0xff]  ;;  %v325_v4 = vld [vmem:[#allocation8 + $0x70] sm:$0xff]  ;;  %s363_s11 = scalar_lea.hbm %s903_s5, %s471_s8  ;;  %s274_s28 = scalar_lea.vmem [#allocation9], %s465_s6 }
  0x32   : > { %331 = vmatpush.msra.mxu1 %v326_v2  ;;  %v324_v5 = vld [vmem:[#allocation8 + $0x68] sm:$0xff]  ;;  %v276_v6 = vld [vmem:[#allocation6] sm:$0xff]  ;;  %v275_v7 = vld [vmem:[%s237_s13] sm:$0xff]  ;;  %s365_s29 = sshll.u32 %s274_s28, 4  ;;  %s367_s30 = sshll.u32 %s363_s11, 4  ;;  %s366_s29 = int_to_ptr.vmem [resolvable:$true] %s365_s29  ;;  %s368_s30 = int_to_ptr.hbm [resolvable:$true] %s367_s30 }
  0x33   : > { %301 = vmatpush.msra.mxu0 %v278_v1  ;;  %v323_v8 = vld [vmem:[#allocation8 + $0x60] sm:$0xff]  ;;  %v322_v9 = vld [vmem:[#allocation8 + $0x58] sm:$0xff]  ;;  %v321_v10 = vld [vmem:[#allocation8 + $0x50] sm:$0xff]  ;;  %s353_s16 = scalar_lea.sflag [#allocation5], %s843_s22  ;;  %s651_s25 = sshra.s32 %s368_s30, 4  ;;  %s652_s25 = int_to_ptr.hbm [resolvable:$true] %s651_s25 }
  0x34   : > { %332 = vmatpush.msra.mxu1 %v325_v4  ;;  %v320_v11 = vld [vmem:[#allocation8 + $0x48] sm:$0xff]  ;;  %v319_v12 = vld [vmem:[#allocation8 + $0x40] sm:$0xff]  ;;  %v318_v13 = vld [vmem:[#allocation8 + $0x38] sm:$0xff]  ;;  %s653_s7 = scalar_lea.hbm %s652_s25, 8  ;;  %s657_s17 = scalar_lea.hbm %s903_s5, 16 }
  0x35   : > { %302 = vmatpush.msra.mxu0 %v277_v3  ;;  %v317_v14 = vld [vmem:[#allocation8 + $0x30] sm:$0xff]  ;;  %v316_v15 = vld [vmem:[#allocation8 + $0x28] sm:$0xff]  ;;  %v315_v16 = vld [vmem:[#allocation8 + $0x20] sm:$0xff]  ;;  %p654_p1 = scmp.ne.s32.totalorder %s652_s25, %s653_s7  ;;  %p658_p12 = scmp.lt.s32.totalorder %s652_s25, %s903_s5 }
  0x36   : > { %333 = vmatpush.msra.mxu1 %v324_v5  ;;  %v314_v17 = vld [vmem:[#allocation8 + $0x18] sm:$0xff]  ;;  %v313_v18 = vld [vmem:[#allocation8 + $0x10] sm:$0xff]  ;;  %v312_v19 = vld [vmem:[#allocation8 + $0x8] sm:$0xff]  ;;  %p659_p7 = scmp.lt.s32.totalorder %s657_s17, %s653_s7 }
  0x37   : > { %303 = vmatpush.msra.mxu0 %v276_v6  ;;  %v311_v20 = vld [vmem:[#allocation8] sm:$0xff]  ;;  %v543_v21 = vld [vmem:[%s900_s2] ss:$0 sm:$0xff]  ;;  %p655_p3 = pnand %p654_p1, %p812_p4 }
  0x38   : > { %469 = vmatmul.msk.f32.vlgmr.msra.gmra.mxu0 %vm284_vm0, %v275_v7  ;;  %334 = vmatpush.msra.mxu1 %v323_v8  ;;  %v544_v25 = vld [vmem:[%s902_s4] ss:$0 sm:$0xff]  ;;  %p660_p8 = por %p659_p7, %p658_p12 }
  0x39   : > { %p656_p5 = pneg %p655_p3 }
  0x3a   : > { %335 = vmatpush.msra.mxu1 %v322_v9 }
  0x3b   : > { %p661_p9 = pnand %p660_p8, %p656_p5 }
  0x3c   : > { %336 = vmatpush.msra.mxu1 %v321_v10 }
  0x3e   : > { %337 = vmatpush.msra.mxu1 %v320_v11 }
  0x40   : > { %338 = vmatpush.msra.mxu1 %v319_v12 }
  0x42   : > { %339 = vmatpush.msra.mxu1 %v318_v13 }
  0x44   : > { %340 = vmatpush.msra.mxu1 %v317_v14 }
  0x46   : > { %341 = vmatpush.msra.mxu1 %v316_v15 }
  0x48   : > { %342 = vmatpush.msra.mxu1 %v315_v16 }
  0x4a   : > { %343 = vmatpush.msra.mxu1 %v314_v17 }
  0x4c   : > { %344 = vmatpush.msra.mxu1 %v313_v18 }
  0x4e   : > { %345 = vmatpush.msra.mxu1 %v312_v19 }
  0x50   : > { %346 = vmatpush.msra.mxu1 %v311_v20 }
  0xb5   : > { %v305_v22 = vpop.f32.mrf.mxu0 }
  0xb6   : > { %v306_v23 = vadd.f32 %v543_v21, %v305_v22 }
  0xb8   : > { %545 = vtanh.f32 %v306_v23 }
  0xbe   : > { %v546_v24 = vpop.eup %545 }
  0xbf   : > { %347 = vmatmul.f32.vlgmr.msra.gmra.mxu1 %v546_v24 }
 0x13c   : > { %v348_v26 = vpop.f32.mrf.mxu1 }
 0x13d   : > { %v349_v27 = vadd.f32 %v544_v25, %v348_v26 }
 0x13f   : > { %351 = vst [vmem:[%s274_s28] sm:$0xff] %v349_v27 }
 0x140   : > { %664 = shalt.err (!%p661_p9)
}
 0x141   : > { %484 = dma.vmem_to_hbm [thread:$0]  (%p812_p4), %s366_s29, 128, %s368_s30, %s353_s16  }
 0x142 PF: > { %s379_s22 = sand.u32 1, %s695_s18   ;;  %p910_p10 = scmp.ge.s32.totalorder %s707_s21, 2 }
 0x143   : > { %s380_s9 = scalar_lea.sflag [#allocation5], %s379_s22 }
 0x144   : > { %p498_p13 = pnand %p910_p10, %p816_p6 }
 0x146   : > { %p499_p11 = pneg %p498_p13 }
 0x148   : > { %690 = dma.done.wait (%p499_p11), %s380_s9, 128  }
 0x149   : > { %692 = vsyncadd (%p499_p11), %s380_s9, 4294967168  ;;  %p19_p0 = scmp.ge.s32.totalorder %s786_s12, 4   ;;  %s911_s18 = smov %s699_s19 }
 0x14a   : > { %s912_s19 = smov %s703_s20  ;;  %s913_s20 = smov %s797_s15 }
 0x14b   : > { %s914_s21 = smov %s786_s12  ;;  %21 = sbr.rel (!%p19_p0) target bundleno = 6 (0x6), region = 93 }
 0x150   :  { %386 = vsyncpa [#allocation4], 1 }
 0x151   :  { %388 = vsyncpa [#allocation4 + $0x1], 1 }
 0x152   :  { %389 = vsyncpa [#allocation7], 1 }
 0x153   :  { %390 = vsyncpa [#allocation5], 1 }
 0x154   :  { %392 = vsyncpa [#allocation5 + $0x1], 1 }

</bundles_post_ra>
